<compile_context>
chip_gen: v6e
topology: v6e:2x2x1
jax: 0.10.0
libtpu: 0.0.40
codegen_flags: <defaults>
</compile_context>

<pallas_src>
import jax
import jax.numpy as jnp
from jax.experimental import pallas as pl
from jax.experimental.pallas import tpu as pltpu


def seq_lstm_kernel(xh_ref, c_ref, w_ref, b_ref, h_out_ref, c_out_ref):
    """One LSTMCell step on a (TB, IN+H) batch tile.

    xh_ref : (TB, IN+H)  concatenated [embedded, h_prev]
    c_ref  : (TB, H)     previous cell state
    w_ref  : (IN+H, 4H)  stacked [W_ih^T ; W_hh^T]   (PyTorch gate order i,f,g,o)
    b_ref  : (1, 4H)     b_ih + b_hh
    """
    H = c_ref.shape[-1]

    # Single fused MXU matmul for all four gates (lane-dense 4H output).
    gates = jnp.dot(xh_ref[...], w_ref[...],
                    preferred_element_type=jnp.float32) + b_ref[...]

    i_g = jax.nn.sigmoid(gates[:, 0 * H:1 * H])
    f_g = jax.nn.sigmoid(gates[:, 1 * H:2 * H])
    g_g = jnp.tanh(gates[:, 2 * H:3 * H])
    o_g = jax.nn.sigmoid(gates[:, 3 * H:4 * H])

    c_new = f_g * c_ref[...] + i_g * g_g
    h_out_ref[...] = o_g * jnp.tanh(c_new)
    c_out_ref[...] = c_new


def seq_lstm_forward(embedded, state, params, *, tb=None):
    """Matches Seq_LSTM.forward(embedded, state) in eval mode.

    Returns (decoder_output, (h_new, c_new)).
    """
    w_ih, w_hh, b_ih, b_hh = params
    h0, c0 = state
    B, IN = embedded.shape
    H = h0.shape[-1]

    # ---- layout plumbing in the wrapper (no compute hoisting) -------------
    # Fused projection weight/bias: gates = [x, h] @ W + b.
    w = jnp.concatenate([jnp.transpose(w_ih), jnp.transpose(w_hh)],
                        axis=0).astype(jnp.float32)            # (IN+H, 4H)
    b = (b_ih + b_hh).reshape(1, 4 * H).astype(jnp.float32)    # (1, 4H)
    xh = jnp.concatenate([embedded, h0], axis=-1)              # (B, IN+H)

    # Pad batch to a multiple of the tile size (full 8-sublane vregs).
    if tb is None:
        tb = min(512, max(8, ((B + 7) // 8) * 8))
    b_pad = ((B + tb - 1) // tb) * tb
    pad = b_pad - B
    xh_p = jnp.pad(xh, ((0, pad), (0, 0)))
    c_p = jnp.pad(c0, ((0, pad), (0, 0)))

    grid = (b_pad // tb,)

    def batched(width):
        return pl.BlockSpec((tb, width), lambda i: (i, 0))

    h_new, c_new = pl.pallas_call(
        seq_lstm_kernel,
        out_shape=(jax.ShapeDtypeStruct((b_pad, H), jnp.float32),
                   jax.ShapeDtypeStruct((b_pad, H), jnp.float32)),
        grid_spec=pltpu.PrefetchScalarGridSpec(
            num_scalar_prefetch=0,
            grid=grid,
            in_specs=[
                batched(IN + H),                                   # xh tile
                batched(H),                                        # c tile
                pl.BlockSpec((IN + H, 4 * H), lambda i: (0, 0)),   # W (resident)
                pl.BlockSpec((1, 4 * H), lambda i: (0, 0)),        # b (resident)
            ],
            out_specs=[batched(H), batched(H)],
        ),
        compiler_params=pltpu.CompilerParams(
            dimension_semantics=("parallel",)),
    )(xh_p, c_p, w, b)

    h_new = h_new[:B]
    c_new = c_new[:B]
    # Dropout on decoder_output is eval-mode identity.
    return h_new, (h_new, c_new)


def seq_lstm_reference(embedded, state, params):
    """Pure-JAX reference matching torch.nn.LSTMCell semantics (eval mode)."""
    w_ih, w_hh, b_ih, b_hh = params
    h0, c0 = state
    gates = embedded @ w_ih.T + b_ih + h0 @ w_hh.T + b_hh
    i_g, f_g, g_g, o_g = jnp.split(gates, 4, axis=-1)   # PyTorch order: i,f,g,o
    i_g = jax.nn.sigmoid(i_g)
    f_g = jax.nn.sigmoid(f_g)
    g_g = jnp.tanh(g_g)
    o_g = jax.nn.sigmoid(o_g)
    c_new = f_g * c0 + i_g * g_g
    h_new = o_g * jnp.tanh(c_new)
    return h_new, (h_new, c_new)


if __name__ == "__main__":
    key = jax.random.PRNGKey(0)
    k_x, k_h, k_c, k_wih, k_whh, k_bih, k_bhh = jax.random.split(key, 7)

    B = 2
    INPUT_SIZE = 32
    HIDDEN_SIZE = 32

    embedded = jax.random.normal(k_x, (B, INPUT_SIZE), dtype=jnp.float32)
    h0 = jax.random.normal(k_h, (B, HIDDEN_SIZE), dtype=jnp.float32)
    c0 = jax.random.normal(k_c, (B, HIDDEN_SIZE), dtype=jnp.float32)

    # deterministic synthetic LSTMCell parameters (PyTorch shapes)
    w_ih = 0.2 * jax.random.normal(k_wih, (4 * HIDDEN_SIZE, INPUT_SIZE),
                                   dtype=jnp.float32)
    w_hh = 0.2 * jax.random.normal(k_whh, (4 * HIDDEN_SIZE, HIDDEN_SIZE),
                                   dtype=jnp.float32)
    b_ih = 0.1 * jax.random.normal(k_bih, (4 * HIDDEN_SIZE,), dtype=jnp.float32)
    b_hh = 0.1 * jax.random.normal(k_bhh, (4 * HIDDEN_SIZE,), dtype=jnp.float32)
    params = (w_ih, w_hh, b_ih, b_hh)

    dec_out, (h_new, c_new) = seq_lstm_forward(embedded, (h0, c0), params)
    dec_out = jax.block_until_ready(dec_out)

    ref_out, (ref_h, ref_c) = seq_lstm_reference(embedded, (h0, c0), params)

    assert dec_out.shape == (B, HIDDEN_SIZE)
    assert jnp.allclose(dec_out, ref_out, rtol=1e-5, atol=1e-5), (
        f"h max abs diff {jnp.max(jnp.abs(dec_out - ref_out))}")
    assert jnp.allclose(c_new, ref_c, rtol=1e-5, atol=1e-5), (
        f"c max abs diff {jnp.max(jnp.abs(c_new - ref_c))}")

    print("KERNEL_OK")
</pallas_src>

<mosaic_0001>
module attributes {stable_mosaic.version = 11 : i64} {
  func.func @seq_lstm_kernel(%arg0: i32, %arg1: memref<8x64xf32, #tpu.memory_space<vmem>>, %arg2: memref<8x32xf32, #tpu.memory_space<vmem>>, %arg3: memref<64x128xf32, #tpu.memory_space<vmem>>, %arg4: memref<1x128xf32, #tpu.memory_space<vmem>>, %arg5: memref<8x32xf32, #tpu.memory_space<vmem>>, %arg6: memref<8x32xf32, #tpu.memory_space<vmem>>) attributes {dimension_semantics = [#tpu.dimension_semantics<parallel>], iteration_bounds = array<i64: 1>, scalar_prefetch = 0 : i64, scratch_operands = 0 : i64, tpu.core_type = #tpu.core_type<tc>, window_params = [{transform_indices = @transform_0, window_bounds = array<i64: 8, 64>}, {transform_indices = @transform_1, window_bounds = array<i64: 8, 32>}, {pipeline_mode = #tpu.pipeline_mode<synchronous>, transform_indices = @transform_2, window_bounds = array<i64: 64, 128>}, {pipeline_mode = #tpu.pipeline_mode<synchronous>, transform_indices = @transform_3, window_bounds = array<i64: 1, 128>}, {transform_indices = @transform_4, window_bounds = array<i64: 8, 32>}, {transform_indices = @transform_5, window_bounds = array<i64: 8, 32>}]} {
    %c0 = arith.constant 0 : index
    %c0_0 = arith.constant 0 : index
    %0 = vector.load %arg1[%c0, %c0_0] : memref<8x64xf32, #tpu.memory_space<vmem>>, vector<8x64xf32>
    %c0_1 = arith.constant 0 : index
    %c0_2 = arith.constant 0 : index
    %1 = vector.load %arg3[%c0_1, %c0_2] : memref<64x128xf32, #tpu.memory_space<vmem>>, vector<64x128xf32>
    %cst = arith.constant dense<0.000000e+00> : vector<8x128xf32>
    %2 = tpu.matmul %0, %1, %cst {dimension_numbers = #tpu.dot_dimension_numbers<[1], [0], [0], [1], [0, 0, 1, 1], [], []>} : vector<8x64xf32>, vector<64x128xf32>, vector<8x128xf32> -> vector<8x128xf32>
    %c0_3 = arith.constant 0 : index
    %c0_4 = arith.constant 0 : index
    %3 = vector.load %arg4[%c0_3, %c0_4] : memref<1x128xf32, #tpu.memory_space<vmem>>, vector<1x128xf32>
    %4 = vector.broadcast %3 : vector<1x128xf32> to vector<8x128xf32>
    %5 = arith.addf %2, %4 : vector<8x128xf32>
    %6 = vector.extract_strided_slice %5 {offsets = [0, 0], sizes = [8, 32], strides = [1, 1]} : vector<8x128xf32> to vector<8x32xf32>
    %7 = arith.negf %6 : vector<8x32xf32>
    %8 = math.exp %7 : vector<8x32xf32>
    %cst_5 = arith.constant 1.000000e+00 : f32
    %9 = vector.broadcast %cst_5 : f32 to vector<8x32xf32>
    %10 = arith.addf %9, %8 : vector<8x32xf32>
    %11 = arith.divf %9, %10 : vector<8x32xf32>
    %12 = vector.extract_strided_slice %5 {offsets = [0, 32], sizes = [8, 32], strides = [1, 1]} : vector<8x128xf32> to vector<8x32xf32>
    %13 = arith.negf %12 : vector<8x32xf32>
    %14 = math.exp %13 : vector<8x32xf32>
    %cst_6 = arith.constant 1.000000e+00 : f32
    %15 = vector.broadcast %cst_6 : f32 to vector<8x32xf32>
    %16 = arith.addf %15, %14 : vector<8x32xf32>
    %17 = arith.divf %15, %16 : vector<8x32xf32>
    %18 = vector.extract_strided_slice %5 {offsets = [0, 64], sizes = [8, 32], strides = [1, 1]} : vector<8x128xf32> to vector<8x32xf32>
    %19 = math.tanh %18 : vector<8x32xf32>
    %20 = vector.extract_strided_slice %5 {offsets = [0, 96], sizes = [8, 32], strides = [1, 1]} : vector<8x128xf32> to vector<8x32xf32>
    %21 = arith.negf %20 : vector<8x32xf32>
    %22 = math.exp %21 : vector<8x32xf32>
    %cst_7 = arith.constant 1.000000e+00 : f32
    %23 = vector.broadcast %cst_7 : f32 to vector<8x32xf32>
    %24 = arith.addf %23, %22 : vector<8x32xf32>
    %25 = arith.divf %23, %24 : vector<8x32xf32>
    %c0_8 = arith.constant 0 : index
    %c0_9 = arith.constant 0 : index
    %26 = vector.load %arg2[%c0_8, %c0_9] : memref<8x32xf32, #tpu.memory_space<vmem>>, vector<8x32xf32>
    %27 = arith.mulf %17, %26 : vector<8x32xf32>
    %28 = arith.mulf %11, %19 : vector<8x32xf32>
    %29 = arith.addf %27, %28 : vector<8x32xf32>
    %30 = math.tanh %29 : vector<8x32xf32>
    %31 = arith.mulf %25, %30 : vector<8x32xf32>
    %c0_10 = arith.constant 0 : index
    %c0_11 = arith.constant 0 : index
    %32 = vector.load %arg5[%c0_10, %c0_11] : memref<8x32xf32, #tpu.memory_space<vmem>>, vector<8x32xf32>
    tpu.vector_store %arg5[%c0_10, %c0_11], %31 {strides = array<i32>} : memref<8x32xf32, #tpu.memory_space<vmem>>, vector<8x32xf32>,
    %c0_12 = arith.constant 0 : index
    %c0_13 = arith.constant 0 : index
    %33 = vector.load %arg6[%c0_12, %c0_13] : memref<8x32xf32, #tpu.memory_space<vmem>>, vector<8x32xf32>
    tpu.vector_store %arg6[%c0_12, %c0_13], %29 {strides = array<i32>} : memref<8x32xf32, #tpu.memory_space<vmem>>, vector<8x32xf32>,
    return
  }
  func.func @transform_0(%arg0: i32) -> (i32, i32) {
    %c0_i32 = arith.constant 0 : i32
    %c0_i32_0 = arith.constant 0 : i32
    return %arg0, %c0_i32 : i32, i32
  }
  func.func @transform_1(%arg0: i32) -> (i32, i32) {
    %c0_i32 = arith.constant 0 : i32
    %c0_i32_0 = arith.constant 0 : i32
    return %arg0, %c0_i32 : i32, i32
  }
  func.func @transform_2(%arg0: i32) -> (i32, i32) {
    %c0_i32 = arith.constant 0 : i32
    %c0_i32_0 = arith.constant 0 : i32
    %c0_i32_1 = arith.constant 0 : i32
    return %c0_i32, %c0_i32_0 : i32, i32
  }
  func.func @transform_3(%arg0: i32) -> (i32, i32) {
    %c0_i32 = arith.constant 0 : i32
    %c0_i32_0 = arith.constant 0 : i32
    %c0_i32_1 = arith.constant 0 : i32
    return %c0_i32, %c0_i32_0 : i32, i32
  }
  func.func @transform_4(%arg0: i32) -> (i32, i32) {
    %c0_i32 = arith.constant 0 : i32
    %c0_i32_0 = arith.constant 0 : i32
    return %arg0, %c0_i32 : i32, i32
  }
  func.func @transform_5(%arg0: i32) -> (i32, i32) {
    %c0_i32 = arith.constant 0 : i32
    %c0_i32_0 = arith.constant 0 : i32
    return %arg0, %c0_i32 : i32, i32
  }
}

</mosaic_0001>

<bundles_post_ra>
// kernel: tpu_custom_call.1
= control target key start
LH: loop header
LB: loop body
LE: loop exit
PB: predicated region body
PF: predicated region fallthrough
CT: control target
= control target key end

     0   :  { %11 = vsyncpa [#allocation3], 0  ;;  %s439_s0 = inlined_call_operand.hbm [shape: f32[8,64], index: 0, kind: input, shape index: {}]   ;;  %s440_s1 = inlined_call_operand.hbm [shape: f32[8,32], index: 1, kind: input, shape index: {}]   ;;  %s441_s2 = inlined_call_operand.hbm [shape: f32[64,128], index: 2, kind: input, shape index: {}]   ;;  %s442_s3 = inlined_call_operand.vmem [shape: f32[1,128], index: 3, kind: input, shape index: {}]   ;;  %s443_s4 = inlined_call_operand.hbm [shape: f32[8,32], index: 4, kind: output, shape index: {0}]   ;;  %s444_s5 = inlined_call_operand.hbm [shape: f32[8,32], index: 5, kind: output, shape index: {1}]  }
   0x1   :  { %12 = vsyncpa [#allocation6], 0 }
   0x2   :  { %13 = vsyncpa [#allocation4], 0 }
   0x3   :  { %14 = vsyncpa [#allocation10], 0  ;;  %s377_s18 = smov [#allocation5]   ;;  %s378_s20 = smov [#allocation2]  }
   0x4   :  { %s31_s19 = sshll.u32 %s377_s18, 4  ;;  %s21_s21 = sshll.u32 %s378_s20, 4  ;;  %s32_s19 = int_to_ptr.vmem [resolvable:$true] %s31_s19  ;;  %s22_s21 = int_to_ptr.vmem [resolvable:$true] %s21_s21 }
   0x5   :  { %s277_s22 = scalar_lea.vmem %s32_s19, 128  ;;  %p282_p1 = scmp.lt.s32.totalorder %s32_s19, %s32_s19 }
   0x6   :  { %p278_p0 = scmp.ne.s32.totalorder %s32_s19, %s277_s22  ;;  %p283_p2 = scmp.lt.s32.totalorder %s277_s22, %s277_s22 }
   0x8   :  { %p284_p3 = por %p283_p2, %p282_p1 }
   0xa   :  { %p285_p4 = pnand %p284_p3, %p278_p0 }
   0xc   :  { %288 = shalt.err (!%p285_p4)
}
   0xd   :  { %34 = dma.hbm_to_vmem [thread:$0]  %s440_s1, 128, %s32_s19, [#allocation6]  }
   0xe   :  { %s297_s25 = scalar_lea.vmem %s22_s21, 128  ;;  %p302_p6 = scmp.lt.s32.totalorder %s22_s21, %s22_s21 }
   0xf   :  { %p298_p5 = scmp.ne.s32.totalorder %s22_s21, %s297_s25  ;;  %p303_p7 = scmp.lt.s32.totalorder %s297_s25, %s297_s25 }
  0x11   :  { %p304_p8 = por %p303_p7, %p302_p6 }
  0x13   :  { %p305_p9 = pnand %p304_p8, %p298_p5 }
  0x15   :  { %308 = shalt.err (!%p305_p9)
}
  0x16   :  { %24 = dma.hbm_to_vmem [thread:$0]  %s439_s0, 128, %s22_s21, [#allocation3]  }
  0x17   :  { %s379_s28 = smov [#allocation7]  }
  0x18   :  { %s40_s29 = sshll.u32 %s379_s28, 4  ;;  %s41_s29 = int_to_ptr.vmem [resolvable:$true] %s40_s29 }
  0x19   :  { %s317_s30 = scalar_lea.vmem %s41_s29, 1024  ;;  %p322_p11 = scmp.lt.s32.totalorder %s41_s29, %s41_s29 }
  0x1a   :  { %p318_p10 = scmp.ne.s32.totalorder %s41_s29, %s317_s30  ;;  %p323_p12 = scmp.lt.s32.totalorder %s317_s30, %s317_s30 }
  0x1c   :  { %p324_p13 = por %p323_p12, %p322_p11 }
  0x1e   :  { %p325_p0 = pnand %p324_p13, %p318_p10 }
  0x20   :  { %328 = shalt.err (!%p325_p0)
}
  0x21   :  { %s380_s1 = smov 128   ;;  %s381_s6 = smov 8  }
  0x22   :  { %46 = dma.hbm_to_vmem [thread:$0]  %s441_s2, 1024, %s41_s29, [#allocation6], %s380_s1, %s380_s1, %s381_s6  }
  0x23   :  { %369 = dma.done.wait [#allocation3], 128  }
  0x24   :  { %370 = vsyncadd [#allocation3], 4294967168 }
  0x25   :  { %371 = dma.done.wait [#allocation6], 1152  }
  0x26   :  { %372 = vsyncadd [#allocation6], 4294966144  ;;  %v382_v0 = vmov 0.0   ;;  %vm383_vm0 = vmmov 0   ;;  %v66_v1 = vld [vmem:[#allocation7 + $0x38] sm:$0xff]  ;;  %v65_v2 = vld [vmem:[#allocation7 + $0x30] sm:$0xff] }
  0x27   :  { %230 = vmatprep.subr.mxu0 %v382_v0  ;;  %246 = vmatprep.mubr.msk.f32.mxu0 %vm383_vm0, %v382_v0  ;;  %v64_v3 = vld [vmem:[#allocation7 + $0x28] sm:$0xff]  ;;  %v63_v4 = vld [vmem:[#allocation7 + $0x20] sm:$0xff]  ;;  %v62_v5 = vld [vmem:[#allocation7 + $0x18] sm:$0xff]  ;;  %vm74_vm1 = vcmask 523264   ;;  %s384_s9 = smov 64   ;;  %s385_s10 = smov 32  }
  0x28   :  { %231 = vmatpush3.msra.mxu0 %v66_v1  ;;  %v61_v6 = vld [vmem:[#allocation7 + $0x10] sm:$0xff]  ;;  %v60_v7 = vld [vmem:[#allocation7 + $0x8] sm:$0xff]  ;;  %v59_v8 = vld [vmem:[#allocation7] sm:$0xff]  ;;  %s387_s11 = smov [#allocation9]   ;;  %vm181_vm2 = vcmask 261120  }
  0x29   :  { %232 = vmatprep.subr.mxu0 %v382_v0  ;;  %v58_v9 = vld [vmem:[#allocation2] sm:$0xff]  ;;  %v155_v15 = vld [vmem:[#allocation5] sm:$0xff]  ;;  %s204_s12 = sshll.u32 %s387_s11, 4  ;;  %s205_s12 = int_to_ptr.vmem [resolvable:$true] %s204_s12 }
  0x2a   :  { %233 = vmatpush3.msra.mxu0 %v65_v2  ;;  %v218_v10 = vld [vmem:[%s442_s3] ss:$0 sm:$0xff]  ;;  %s386_s3 = smov 96   ;;  %s329_s13 = scalar_lea.vmem %s205_s12, 128 }
  0x2b   :  { %234 = vmatprep.subr.mxu0 %v382_v0  ;;  %p330_p1 = scmp.ne.s32.totalorder %s205_s12, %s329_s13  ;;  %p334_p2 = scmp.lt.s32.totalorder %s205_s12, %s205_s12 }
  0x2c   :  { %235 = vmatpush3.msra.mxu0 %v64_v3  ;;  %p335_p3 = scmp.lt.s32.totalorder %s329_s13, %s329_s13 }
  0x2d   :  { %236 = vmatprep.subr.mxu0 %v382_v0 }
  0x2e   :  { %237 = vmatpush3.msra.mxu0 %v63_v4  ;;  %p336_p4 = por %p335_p3, %p334_p2 }
  0x2f   :  { %238 = vmatprep.subr.mxu0 %v382_v0 }
  0x30   :  { %239 = vmatpush3.msra.mxu0 %v62_v5  ;;  %p337_p5 = pnand %p336_p4, %p330_p1 }
  0x31   :  { %240 = vmatprep.subr.mxu0 %v382_v0 }
  0x32   :  { %241 = vmatpush3.msra.mxu0 %v61_v6 }
  0x33   :  { %242 = vmatprep.subr.mxu0 %v382_v0 }
  0x34   :  { %243 = vmatpush3.msra.mxu0 %v60_v7 }
  0x35   :  { %244 = vmatprep.subr.mxu0 %v382_v0 }
  0x36   :  { %245 = vmatpush3.msra.mxu0 %v59_v8 }
  0x37   :  { %247 = vmatmul.mubr.msk.f32.vlgmr.msra.gmra.mxu0 %vm74_vm1, %v58_v9 }
  0xf7   :  { %v144_v11 = vpop.f32.mrf.mxu0 }
  0xf8   :  { %v145_v12 = vadd.f32 %v218_v10, %v144_v11 }
  0xf9   :  { %v248_v13 = vpop.f32.mrf.mxu0 }
  0xfa   :  { %261 = vtanh.f32 %v145_v12  ;;  %v220_v16 = vmul.f32 -1.442695, %v145_v12 }
  0xfc   :  { %263 = vpow2.f32 %v220_v16 }
 0x107   :  { %v262_v14 = vpop.eup %261 }
 0x108   :  { %162 = vrot.lane.b32.xlu0 %v262_v14, %s384_s9 }
 0x109   :  { %v264_v17 = vpop.eup %263 }
 0x10a   :  { %v151_v18 = vadd.f32 1.0, %v264_v17 }
 0x10c   :  { %157 = vrot.lane.b32.xlu0 %v155_v15, %s385_s10  ;;  %265 = vrcp.f32 %v151_v18 }
 0x119   :  { %v266_v19 = vpop.eup %265 }
 0x17a   :  { %v163_v20 = vpop.permute.xlu0 %162 }
 0x17b   :  { %v165_v21 = vmul.f32 %v266_v19, %v163_v20 }
 0x17d   :  { %167 = vrot.lane.b32.xlu1 %v165_v21, %s385_s10 }
 0x17e   :  { %v158_v22 = vpop.permute.xlu0 %157 }
 0x17f   :  { %v160_v23 = vmul.f32 %v266_v19, %v158_v22 }
 0x1ef   :  { %v168_v24 = vpop.permute.xlu1 %167 }
 0x1f0   :  { %v170_v25 = vadd.f32 %v168_v24, %v160_v23 }
 0x1f2   :  { %267 = vtanh.f32 %v170_v25 }
 0x1ff   :  { %v268_v26 = vpop.eup %267 }
 0x200   :  { %173 = vrot.lane.b32.xlu1 %v268_v26, %s384_s9 }
 0x204   :  { %184 = vrot.lane.b32.xlu1 %v170_v25, %s386_s3 }
 0x272   :  { %v174_v27 = vpop.permute.xlu1 %173 }
 0x273   :  { %v176_v28 = vmul.f32 %v266_v19, %v174_v27 }
 0x275   :  { %178 = vrot.lane.b32.xlu0 %v176_v28, %s385_s10 }
 0x276   :  { %v185_v29 = vpop.permute.xlu1 %184 }
 0x277   :  { %187 = vst.msk [vmem:[#allocation9] sm:$0xff] %vm181_vm2, %v185_v29 }
 0x278   :  { %340 = shalt.err (!%p337_p5)
}
 0x279   :  { %207 = dma.vmem_to_hbm [thread:$0]  %s205_s12, 128, %s444_s5, [#allocation10]  }
 0x27a   :  { %s388_s16 = smov [#allocation8]  }
 0x27b   :  { %s194_s17 = sshll.u32 %s388_s16, 4  ;;  %s195_s17 = int_to_ptr.vmem [resolvable:$true] %s194_s17 }
 0x27c   :  { %s349_s18 = scalar_lea.vmem %s195_s17, 128  ;;  %p354_p7 = scmp.lt.s32.totalorder %s195_s17, %s195_s17 }
 0x27d   :  { %p350_p6 = scmp.ne.s32.totalorder %s195_s17, %s349_s18  ;;  %p355_p8 = scmp.lt.s32.totalorder %s349_s18, %s349_s18 }
 0x27f   :  { %p356_p9 = por %p355_p8, %p354_p7 }
 0x281   :  { %p357_p10 = pnand %p356_p9, %p350_p6 }
 0x2e7   :  { %v179_v30 = vpop.permute.xlu0 %178 }
 0x2e8   :  { %182 = vst.msk [vmem:[#allocation8] sm:$0xff] %vm181_vm2, %v179_v30 }
 0x2e9   :  { %360 = shalt.err (!%p357_p10)
}
 0x2ea   :  { %197 = dma.vmem_to_hbm [thread:$0]  %s195_s17, 128, %s443_s4, [#allocation4]  }
 0x2eb   :  { %373 = dma.done.wait [#allocation4], 128  }
 0x2ec   :  { %374 = vsyncadd [#allocation4], 4294967168 }
 0x2ed   :  { %375 = dma.done.wait [#allocation10], 128  }
 0x2ee   :  { %376 = vsyncadd [#allocation10], 4294967168 }
 0x2ef   :  { %214 = vsyncpa [#allocation3], 1 }
 0x2f0   :  { %215 = vsyncpa [#allocation6], 1 }
 0x2f1   :  { %216 = vsyncpa [#allocation4], 1 }
 0x2f2   :  { %217 = vsyncpa [#allocation10], 1 }

</bundles_post_ra>
